<compile_context>
chip_gen: v5e
topology: v5e:2x2
jax: 0.10.0
libtpu: 0.0.40
codegen_flags: <defaults>
</compile_context>

<pallas_src>
import math

import jax
import jax.numpy as jnp
from jax.experimental import pallas as pl
from jax.experimental.pallas import tpu as pltpu


LANES = 512            # lane-dense slab width (multiple of 128 -> unmasked vst)
MAX_TILE_ROWS = 1024   # 1024 rows x 512 lanes x 4 B = 2 MiB per block


def _poly_kernel(coef_ref, x_ref, o_ref):
    # coef_ref: SMEM (4,) float32 -> [a, b, c, d]
    a = coef_ref[0]
    b = coef_ref[1]
    c = coef_ref[2]
    d = coef_ref[3]
    x = x_ref[...]
    # Horner's form: a + b*x + c*x^2 + d*x^3 == ((d*x + c)*x + b)*x + a
    o_ref[...] = ((d * x + c) * x + b) * x + a


def poly_forward(x, a, b, c, d):
    """Elementwise cubic polynomial, computed in a Pallas TPU kernel.

    x: 1-D float32 array of arbitrary length.
    a, b, c, d: scalar float32 parameters (shape (1,) like the nn.Parameters).
    """
    x = jnp.asarray(x, jnp.float32)
    n = x.shape[0]

    # View x as a lane-dense (rows, 512) slab. Pad only to the next multiple
    # of LANES; when n is already a multiple the reshape is free (no copy).
    rows = pl.cdiv(n, LANES)
    padded = rows * LANES
    if padded != n:
        x = jnp.pad(x, (0, padded - n))
    x2d = x.reshape(rows, LANES)

    coefs = jnp.concatenate(
        [jnp.ravel(a), jnp.ravel(b), jnp.ravel(c), jnp.ravel(d)]
    ).astype(jnp.float32)

    if rows <= MAX_TILE_ROWS:
        # Single block covering the whole slab (full-array block shape, so no
        # (8,128) divisibility requirement and no grid-step overhead).
        tile_rows = rows
    else:
        # Fixed 2 MiB tiles; the last (partial) block is masked by Pallas.
        tile_rows = MAX_TILE_ROWS

    grid = (pl.cdiv(rows, tile_rows),)

    out2d = pl.pallas_call(
        _poly_kernel,
        out_shape=jax.ShapeDtypeStruct((rows, LANES), jnp.float32),
        grid=grid,
        in_specs=[
            pl.BlockSpec(memory_space=pltpu.SMEM),               # coefficients
            pl.BlockSpec((tile_rows, LANES), lambda i: (i, 0)),  # x tile
        ],
        out_specs=pl.BlockSpec((tile_rows, LANES), lambda i: (i, 0)),
        compiler_params=pltpu.CompilerParams(
            dimension_semantics=("parallel",),                   # v7x: 2 TCs
            vmem_limit_bytes=32 * 1024 * 1024,
        ),
    )(coefs, x2d)

    out = out2d.reshape(padded)
    return out[:n] if padded != n else out


if __name__ == "__main__":
    # Deterministic parameter init (stand-in for torch.randn on each Parameter).
    key = jax.random.PRNGKey(0)
    ka, kb, kc, kd = jax.random.split(key, 4)
    a = jax.random.normal(ka, (1,), jnp.float32)
    b = jax.random.normal(kb, (1,), jnp.float32)
    c = jax.random.normal(kc, (1,), jnp.float32)
    d = jax.random.normal(kd, (1,), jnp.float32)

    # Same input as the original script: linspace(-pi, pi, 2000).
    x = jnp.linspace(-math.pi, math.pi, 2000, dtype=jnp.float32)

    y = poly_forward(x, a, b, c, d)
    y = jax.block_until_ready(y)

    y_ref = a[0] + b[0] * x + c[0] * x**2 + d[0] * x**3
    assert y.shape == x.shape
    assert jnp.allclose(y, y_ref, atol=1e-5, rtol=1e-5)

    # Also exercise the multi-block (tiled grid, partial last block) path.
    x_big = jnp.linspace(-math.pi, math.pi, 3_000_000, dtype=jnp.float32)
    y_big = jax.block_until_ready(poly_forward(x_big, a, b, c, d))
    y_big_ref = a[0] + b[0] * x_big + c[0] * x_big**2 + d[0] * x_big**3
    assert y_big.shape == x_big.shape
    assert jnp.allclose(y_big, y_big_ref, atol=1e-4, rtol=1e-5)

    print("KERNEL_OK")
</pallas_src>

<mosaic_0001>
module attributes {stable_mosaic.version = 11 : i64} {
  func.func @_poly_kernel(%arg0: i32, %arg1: memref<4xf32, #tpu.memory_space<smem>>, %arg2: memref<4x512xf32, #tpu.memory_space<vmem>>, %arg3: memref<4x512xf32, #tpu.memory_space<vmem>>) attributes {dimension_semantics = [#tpu.dimension_semantics<parallel>], iteration_bounds = array<i64: 1>, scalar_prefetch = 0 : i64, scratch_operands = 0 : i64, tpu.core_type = #tpu.core_type<tc>, window_params = [{transform_indices = @transform_0, window_bounds = array<i64: 4>}, {transform_indices = @transform_1, window_bounds = array<i64: 4, 512>}, {transform_indices = @transform_2, window_bounds = array<i64: 4, 512>}]} {
    %c0 = arith.constant 0 : index
    %0 = memref.load %arg1[%c0] : memref<4xf32, #tpu.memory_space<smem>>
    %c1 = arith.constant 1 : index
    %1 = memref.load %arg1[%c1] : memref<4xf32, #tpu.memory_space<smem>>
    %c2 = arith.constant 2 : index
    %2 = memref.load %arg1[%c2] : memref<4xf32, #tpu.memory_space<smem>>
    %c3 = arith.constant 3 : index
    %3 = memref.load %arg1[%c3] : memref<4xf32, #tpu.memory_space<smem>>
    %c0_0 = arith.constant 0 : index
    %c0_1 = arith.constant 0 : index
    %4 = vector.load %arg2[%c0_0, %c0_1] : memref<4x512xf32, #tpu.memory_space<vmem>>, vector<4x512xf32>
    %5 = vector.broadcast %3 : f32 to vector<4x512xf32>
    %6 = arith.mulf %5, %4 : vector<4x512xf32>
    %7 = vector.broadcast %2 : f32 to vector<4x512xf32>
    %8 = arith.addf %6, %7 : vector<4x512xf32>
    %9 = arith.mulf %8, %4 : vector<4x512xf32>
    %10 = vector.broadcast %1 : f32 to vector<4x512xf32>
    %11 = arith.addf %9, %10 : vector<4x512xf32>
    %12 = arith.mulf %11, %4 : vector<4x512xf32>
    %13 = vector.broadcast %0 : f32 to vector<4x512xf32>
    %14 = arith.addf %12, %13 : vector<4x512xf32>
    %c0_2 = arith.constant 0 : index
    %c0_3 = arith.constant 0 : index
    %15 = vector.load %arg3[%c0_2, %c0_3] : memref<4x512xf32, #tpu.memory_space<vmem>>, vector<4x512xf32>
    tpu.vector_store %arg3[%c0_2, %c0_3], %14 {strides = array<i32>} : memref<4x512xf32, #tpu.memory_space<vmem>>, vector<4x512xf32>,
    return
  }
  func.func @transform_0(%arg0: i32) -> i32 {
    %c0_i32 = arith.constant 0 : i32
    %c0_i32_0 = arith.constant 0 : i32
    return %c0_i32 : i32
  }
  func.func @transform_1(%arg0: i32) -> (i32, i32) {
    %c0_i32 = arith.constant 0 : i32
    %c0_i32_0 = arith.constant 0 : i32
    return %arg0, %c0_i32 : i32, i32
  }
  func.func @transform_2(%arg0: i32) -> (i32, i32) {
    %c0_i32 = arith.constant 0 : i32
    %c0_i32_0 = arith.constant 0 : i32
    return %arg0, %c0_i32 : i32, i32
  }
}

</mosaic_0001>

<bundles_post_ra>
// kernel: tpu_custom_call.1
= control target key start
LH: loop header
LB: loop body
LE: loop exit
PB: predicated region body
PF: predicated region fallthrough
CT: control target
= control target key end

     0   :  { %7 = vsyncpa [#allocation5], 0  ;;  %s180_s0 = inlined_call_operand.hbm [shape: f32[4], index: 0, kind: input, shape index: {}]   ;;  %s181_s1 = inlined_call_operand.hbm [shape: f32[4,512], index: 1, kind: input, shape index: {}]   ;;  %s182_s2 = inlined_call_operand.hbm [shape: f32[4,512], index: 2, kind: output, shape index: {}]  }
   0x1   :  { %8 = vsyncpa [#allocation3], 0 }
   0x2   :  { %9 = vsyncpa [#allocation4], 0  ;;  %s15_s11 = sshll.u32 %s180_s0, 4  ;;  %s24_s14 = sshll.u32 %s181_s1, 4  ;;  %s16_s11 = int_to_ptr.hbm [resolvable:$true] %s15_s11  ;;  %s25_s14 = int_to_ptr.hbm [resolvable:$true] %s24_s14 }
   0x3   :  { %s153_s15 = smov [#allocation2]   ;;  %s154_s16 = smov [#allocation6]  }
   0x4   :  { %18 = dma.hbm_to_smem %s16_s11, 16, %s153_s15, [#allocation5]  }
   0x5   :  { %s26_s17 = sshll.u32 %s154_s16, 4  ;;  %s27_s17 = int_to_ptr.vmem [resolvable:$true] %s26_s17 }
   0x6   :  { %29 = dma.hbm_to_vmem [thread:$0]  %s25_s14, 256, %s27_s17, [#allocation3]  }
   0x7   :  { %147 = dma.done.wait [#allocation5], 16  }
   0x8   :  { %148 = vsyncadd [#allocation5], 4294967280 }
   0x9   :  { %149 = dma.done.wait [#allocation3], 256  }
   0xa   :  { %150 = vsyncadd [#allocation3], 4294967040 }
   0xb   :  { %38 = sfence }
   0xc   :  { %s82_s18 = sld [smem:[#allocation2 + $0x2]]  ;;  %v43_v0 = vld [vmem:[#allocation6] sm:$0xff]  ;;  %v44_v1 = vld [vmem:[#allocation6 + $0x8] sm:$0xff]  ;;  %s155_s1 = smov [#allocation7]  }
   0xd   :  { %s83_s19 = sld [smem:[#allocation2 + $0x3]]  ;;  %s68_s21 = sshll.u32 %s155_s1, 4  ;;  %s69_s21 = int_to_ptr.vmem [resolvable:$true] %s68_s21 }
   0xe   :  { %s81_s0 = sld [smem:[#allocation2 + $0x1]]  ;;  %s70_s24 = sshll.u32 %s182_s2, 4  ;;  %s71_s24 = int_to_ptr.hbm [resolvable:$true] %s70_s24 }
   0xf   :  { %s39_s20 = sld [smem:[#allocation2]] }
  0x12   :  { %v48_v3 = vstv %s82_s18 }
  0x13   :  { %v45_v2 = vstv %s83_s19 }
  0x14   :  { %v46_v4 = vmul.f32 %v45_v2, %v43_v0  ;;  %v47_v5 = vmul.f32 %v45_v2, %v44_v1  ;;  %v53_v8 = vstv %s81_s0 }
  0x15   :  { %v58_v13 = vstv %s39_s20 }
  0x16   :  { %v49_v6 = vadd.f32 %v48_v3, %v46_v4  ;;  %v50_v7 = vadd.f32 %v48_v3, %v47_v5 }
  0x18   :  { %v51_v9 = vmul.f32 %v49_v6, %v43_v0  ;;  %v52_v10 = vmul.f32 %v50_v7, %v44_v1 }
  0x1a   :  { %v54_v11 = vadd.f32 %v53_v8, %v51_v9  ;;  %v55_v12 = vadd.f32 %v53_v8, %v52_v10 }
  0x1c   :  { %v56_v14 = vmul.f32 %v54_v11, %v43_v0  ;;  %v57_v15 = vmul.f32 %v55_v12, %v44_v1 }
  0x1e   :  { %v59_v16 = vadd.f32 %v58_v13, %v56_v14  ;;  %v60_v17 = vadd.f32 %v58_v13, %v57_v15 }
  0x20   :  { %61 = vst [vmem:[#allocation7] sm:$0xff] %v59_v16 }
  0x21   :  { %62 = vst [vmem:[#allocation7 + $0x8] sm:$0xff] %v60_v17 }
  0x22   :  { %73 = dma.vmem_to_hbm [thread:$0]  %s69_s21, 256, %s71_s24, [#allocation4]  }
  0x23   :  { %151 = dma.done.wait [#allocation4], 256  }
  0x24   :  { %152 = vsyncadd [#allocation4], 4294967040 }
  0x25   :  { %78 = vsyncpa [#allocation3], 1 }
  0x26   :  { %79 = vsyncpa [#allocation4], 1 }
  0x27   :  { %80 = vsyncpa [#allocation5], 1 }

</bundles_post_ra>
